<compile_context>
chip_gen: v5e
topology: v5e:2x2
jax: 0.10.0
libtpu: 0.0.40
codegen_flags: <defaults>
</compile_context>

<pallas_src>
import functools
import math

import jax
import jax.numpy as jnp
from jax.experimental import pallas as pl
from jax.experimental.pallas import tpu as pltpu

_MIB = 1024 * 1024


def _round_up(x, m):
    return ((x + m - 1) // m) * m


def _avg_readout_single_kernel(x_ref, o_ref, *, inv_n, n_groups, d_out):
    """Whole reduction extent in one block: sum, group-reduce, scale, store.

    x_ref: (tile_bc, n_packed, n_groups * d_out)   lane-dense input tile
    o_ref: (tile_bc, d_out)                        output tile
    """
    s = jnp.sum(x_ref[...].astype(jnp.float32), axis=1)  # (tile_bc, n_groups*d_out)
    total = s[:, 0:d_out]
    for g in range(1, n_groups):  # static, small (<= 128)
        total = total + s[:, g * d_out:(g + 1) * d_out]
    o_ref[...] = (total * jnp.float32(inv_n)).astype(o_ref.dtype)


def _avg_readout_multi_kernel(x_ref, o_ref, acc_ref, *, inv_n, n_groups, d_out):
    """Multi-step reduction with a resident f32 accumulator.

    x_ref:   (tile_bc, tile_n, n_groups * d_out)
    o_ref:   (tile_bc, d_out)           resident across grid axis 1
    acc_ref: (tile_bc, n_groups * d_out) float32 scratch
    """
    j = pl.program_id(1)  # reduction axis: last grid axis, "arbitrary"

    @pl.when(j == 0)
    def _init():
        acc_ref[...] = jnp.zeros_like(acc_ref)

    # Sublane-axis sum of this tile (XLU work, hidden under the input DMA).
    acc_ref[...] += jnp.sum(x_ref[...].astype(jnp.float32), axis=1)

    @pl.when(j == pl.num_programs(1) - 1)
    def _finalize():
        s = acc_ref[...]
        total = s[:, 0:d_out]
        for g in range(1, n_groups):
            total = total + s[:, g * d_out:(g + 1) * d_out]
        o_ref[...] = (total * jnp.float32(inv_n)).astype(o_ref.dtype)


def _tpu_budgets():
    """Generation-aware (target block bytes, VMEM-limit cap)."""
    vmem_cap = 128 * _MIB
    try:
        info = pltpu.get_tpu_info()
        vmem_cap = int(getattr(info, "vmem_capacity_bytes", vmem_cap)) or vmem_cap
    except Exception:
        pass
    if vmem_cap <= 80 * _MIB:
        # v7x-class: 64 MiB VMEM per TC, 3.2 TB/s HBM -> big blocks, tight cap.
        return 12 * _MIB, 44 * _MIB
    # v5e/v6e: 128 MiB VMEM.  8 MiB blocks are past the roofline knee on both.
    return 8 * _MIB, 96 * _MIB


def avg_readout(embeds, *, target_block_bytes=None):
    """Mean over axis 2 of a (B, C, N, D) array -> (B, C, D)."""
    B, C, N, D = embeds.shape
    BC = B * C
    dtype = embeds.dtype
    itemsize = jnp.dtype(dtype).itemsize
    # Sublane alignment: 8 for 4-byte, 16 for 2-byte, 32 for 1-byte dtypes.
    align = max(8, 32 // max(itemsize, 1))

    auto_target, vmem_cap = _tpu_budgets()
    if target_block_bytes is None:
        target_block_bytes = auto_target
    target_block_bytes = max(int(target_block_bytes), 1)

    # --- Lane-dense packing: fold k reduction rows into the lane axis so each
    # packed row is a multiple of 128 lanes. Zero-pad N (free for a sum) unless
    # the padding would inflate the read volume by more than ~25%.
    k = 1
    if D % 128 != 0:
        k_full = 128 // math.gcd(D, 128)
        if (_round_up(N, k_full) - N) * 4 <= N:
            k = k_full
        else:
            k = math.gcd(N, k_full)  # partial packing, no padding
    n_pad_rows = _round_up(N, k) - N
    n_packed = (N + n_pad_rows) // k
    lanes = k * D
    row_bytes = lanes * itemsize  # bytes per packed row per bc-row

    # --- Tile the (packed) reduction axis first: prefer a single reduction
    # step (contiguous per-bc-row HBM read, no accumulator RMW) when it fits.
    if align * n_packed * row_bytes <= target_block_bytes:
        tile_n = n_packed
    else:
        tile_n = max(target_block_bytes // (align * row_bytes), 1)
        tile_n = max((tile_n // align) * align, align)
        tile_n = min(tile_n, _round_up(n_packed, align))

    # --- Tile the flattened "parallel" BC axis from the leftover budget.
    tile_bc = max((target_block_bytes // (tile_n * row_bytes)) // align * align, align)
    if BC >= 2 * align:
        # v7x megacore: keep >= 2 blocks on the parallel axis so both
        # TensorCores get work (no-op on single-TC v5e/v6e).
        tile_bc = min(tile_bc, max((BC // 2) // align * align, align))
    tile_bc = min(tile_bc, _round_up(BC, align))
    tile_bc = max(tile_bc, align)

    bc_padded = _round_up(BC, tile_bc)
    n_packed_padded = _round_up(n_packed, tile_n)
    grid = (bc_padded // tile_bc, n_packed_padded // tile_n)
    single_step = grid[1] == 1

    # --- Build the packed, padded input (all pads are zeros -> exact sum).
    x = embeds.reshape(BC, N, D)
    if n_pad_rows:
        x = jnp.pad(x, ((0, 0), (0, n_pad_rows), (0, 0)))
    x = x.reshape(BC, n_packed, lanes)  # contiguous merge: free reshape
    pad_bc = bc_padded - BC
    pad_n = n_packed_padded - n_packed
    if pad_bc or pad_n:
        x = jnp.pad(x, ((0, pad_bc), (0, pad_n), (0, 0)))

    # --- VMEM budget derived from the actual buffers (2x double-buffered
    # input block + 2x output block + accumulator), capped per generation.
    in_block_bytes = tile_bc * tile_n * lanes * itemsize
    out_block_bytes = tile_bc * D * itemsize
    acc_bytes = 0 if single_step else tile_bc * lanes * 4
    vmem_limit = 2 * in_block_bytes + 2 * out_block_bytes + acc_bytes + 2 * _MIB
    vmem_limit = int(min(max(vmem_limit, 16 * _MIB), vmem_cap))

    cost = pl.CostEstimate(
        flops=BC * N * D,
        transcendentals=0,
        bytes_accessed=int(x.size) * itemsize + BC * D * itemsize,
    )

    if single_step:
        kernel = functools.partial(
            _avg_readout_single_kernel, inv_n=1.0 / N, n_groups=k, d_out=D)
        scratch = []
    else:
        kernel = functools.partial(
            _avg_readout_multi_kernel, inv_n=1.0 / N, n_groups=k, d_out=D)
        scratch = [pltpu.VMEM((tile_bc, lanes), jnp.float32)]

    out = pl.pallas_call(
        kernel,
        out_shape=jax.ShapeDtypeStruct((bc_padded, D), dtype),
        grid_spec=pltpu.PrefetchScalarGridSpec(
            num_scalar_prefetch=0,
            grid=grid,
            in_specs=[
                pl.BlockSpec((tile_bc, tile_n, lanes), lambda i, j: (i, j, 0)),
            ],
            out_specs=pl.BlockSpec((tile_bc, D), lambda i, j: (i, 0)),
            scratch_shapes=scratch,
        ),
        compiler_params=pltpu.CompilerParams(
            dimension_semantics=("parallel", "arbitrary"),
            vmem_limit_bytes=vmem_limit,
        ),
        cost_estimate=cost,
    )(x)

    return out[:BC].reshape(B, C, D)


if __name__ == "__main__":
    key = jax.random.PRNGKey(0)

    # Small shapes consistent with the module: (batch, channels, nodes, hidden)
    B, C, N, D = 2, 4, 16, 32
    embeds = jax.random.normal(key, (B, C, N, D), dtype=jnp.float32)
    out = jax.block_until_ready(avg_readout(embeds))
    ref = jnp.mean(embeds, axis=2)
    assert out.shape == (B, C, D)
    assert jnp.allclose(out, ref, atol=1e-5, rtol=1e-5)

    # Force a multi-step reduction grid (exercises init / accumulate /
    # finalize across several "arbitrary" steps).
    embeds2 = jax.random.normal(jax.random.PRNGKey(0), (2, 4, 64, 32),
                                dtype=jnp.float32)
    out2 = jax.block_until_ready(avg_readout(embeds2, target_block_bytes=32768))
    ref2 = jnp.mean(embeds2, axis=2)
    assert jnp.allclose(out2, ref2, atol=1e-5, rtol=1e-5)

    # Ragged extents: odd N (exercises zero-padding of the packed reduction
    # axis) and BC not a multiple of the sublane alignment (BC padding).
    embeds3 = jax.random.normal(jax.random.PRNGKey(0), (2, 3, 10, 32),
                                dtype=jnp.float32)
    out3 = jax.block_until_ready(avg_readout(embeds3))
    ref3 = jnp.mean(embeds3, axis=2)
    assert out3.shape == (2, 3, 32)
    assert jnp.allclose(out3, ref3, atol=1e-5, rtol=1e-5)

    print("KERNEL_OK")
</pallas_src>

<mosaic_0001>
module attributes {stable_mosaic.version = 11 : i64} {
  func.func @_avg_readout_single_kernel(%arg0: i32, %arg1: i32, %arg2: memref<8x4x128xf32, #tpu.memory_space<vmem>>, %arg3: memref<8x32xf32, #tpu.memory_space<vmem>>) attributes {dimension_semantics = [#tpu.dimension_semantics<parallel>, #tpu.dimension_semantics<arbitrary>], iteration_bounds = array<i64: 1, 1>, scalar_prefetch = 0 : i64, scratch_operands = 0 : i64, tpu.core_type = #tpu.core_type<tc>, window_params = [{transform_indices = @transform_0, window_bounds = array<i64: 8, 4, 128>}, {transform_indices = @transform_1, window_bounds = array<i64: 8, 32>}]} {
    %c0 = arith.constant 0 : index
    %c0_0 = arith.constant 0 : index
    %c0_1 = arith.constant 0 : index
    %0 = vector.load %arg2[%c0, %c0_0, %c0_1] : memref<8x4x128xf32, #tpu.memory_space<vmem>>, vector<8x4x128xf32>
    %cst = arith.constant dense<0.000000e+00> : vector<8x128xf32>
    %1 = vector.multi_reduction <add>, %0, %cst [1] : vector<8x4x128xf32> to vector<8x128xf32>
    %2 = vector.extract_strided_slice %1 {offsets = [0, 0], sizes = [8, 32], strides = [1, 1]} : vector<8x128xf32> to vector<8x32xf32>
    %3 = vector.extract_strided_slice %1 {offsets = [0, 32], sizes = [8, 32], strides = [1, 1]} : vector<8x128xf32> to vector<8x32xf32>
    %4 = arith.addf %2, %3 : vector<8x32xf32>
    %5 = vector.extract_strided_slice %1 {offsets = [0, 64], sizes = [8, 32], strides = [1, 1]} : vector<8x128xf32> to vector<8x32xf32>
    %6 = arith.addf %4, %5 : vector<8x32xf32>
    %7 = vector.extract_strided_slice %1 {offsets = [0, 96], sizes = [8, 32], strides = [1, 1]} : vector<8x128xf32> to vector<8x32xf32>
    %8 = arith.addf %6, %7 : vector<8x32xf32>
    %cst_2 = arith.constant 6.250000e-02 : f32
    %9 = vector.broadcast %cst_2 : f32 to vector<8x32xf32>
    %10 = arith.mulf %8, %9 : vector<8x32xf32>
    %c0_3 = arith.constant 0 : index
    %c0_4 = arith.constant 0 : index
    %11 = vector.load %arg3[%c0_3, %c0_4] : memref<8x32xf32, #tpu.memory_space<vmem>>, vector<8x32xf32>
    tpu.vector_store %arg3[%c0_3, %c0_4], %10 {strides = array<i32>} : memref<8x32xf32, #tpu.memory_space<vmem>>, vector<8x32xf32>,
    return
  }
  func.func @transform_0(%arg0: i32, %arg1: i32) -> (i32, i32, i32) {
    %c0_i32 = arith.constant 0 : i32
    %c0_i32_0 = arith.constant 0 : i32
    return %arg0, %arg1, %c0_i32 : i32, i32, i32
  }
  func.func @transform_1(%arg0: i32, %arg1: i32) -> (i32, i32) {
    %c0_i32 = arith.constant 0 : i32
    %c0_i32_0 = arith.constant 0 : i32
    return %arg0, %c0_i32 : i32, i32
  }
}

</mosaic_0001>

<bundles_post_ra>
// kernel: tpu_custom_call.1
= control target key start
LH: loop header
LB: loop body
LE: loop exit
PB: predicated region body
PF: predicated region fallthrough
CT: control target
= control target key end

     0   :  { %6 = vsyncpa [#allocation3], 0  ;;  %s387_s0 = inlined_call_operand.hbm [shape: f32[8,4,128], index: 0, kind: input, shape index: {}]   ;;  %s388_s1 = inlined_call_operand.hbm [shape: f32[8,32], index: 1, kind: output, shape index: {}]  }
   0x1   :  { %7 = vsyncpa [#allocation4], 0  ;;  %s12_s8 = sshll.u32 %s387_s0, 4  ;;  %s309_s9 = smov [#allocation2]   ;;  %s13_s8 = int_to_ptr.hbm [resolvable:$true] %s12_s8 }
   0x2   :  { %s14_s10 = sshll.u32 %s309_s9, 4  ;;  %s310_s11 = smov 64   ;;  %s15_s10 = int_to_ptr.vmem [resolvable:$true] %s14_s10 }
   0x3   :  { %s311_s12 = smov 4  }
   0x4   :  { %20 = dma.hbm_to_vmem [thread:$0]  %s13_s8, 512, %s15_s10, [#allocation3], %s310_s11, %s310_s11, %s311_s12  }
   0x5   :  { %305 = dma.done.wait [#allocation3], 512  }
   0x6   :  { %306 = vsyncadd [#allocation3], 4294966784  ;;  %vm33_vm0 = vcmask 1043456   ;;  %v27_v0 = vld [vmem:[#allocation2 + $0x8] sm:$0xf]  ;;  %s312_s0 = smov 96  }
   0x7   :  { %v25_v1 = vld [vmem:[#allocation2] sm:$0xf]  ;;  %v29_v2 = vld [vmem:[#allocation2 + $0x10] sm:$0xf]  ;;  %v48_v3 = vsel %vm33_vm0, %v27_v0, 0.0  ;;  %s313_s13 = smov 32  }
   0x8   :  { %v34_v4 = vsel %vm33_vm0, %v25_v1, 0.0  ;;  %v62_v5 = vsel %vm33_vm0, %v29_v2, 0.0  ;;  %v28_v6 = vld [vmem:[#allocation2 + $0xc] sm:$0xf]  ;;  %v49_v7 = vrot.slane %v48_v3, 4  ;;  %vm211_vm1 = vcmask 1041409  }
   0x9   :  { %v35_v8 = vrot.slane %v34_v4, 4  ;;  %v63_v9 = vrot.slane %v62_v5, 4  ;;  %v55_v10 = vsel %vm33_vm0, %v28_v6, 0.0  ;;  %v26_v11 = vld [vmem:[#allocation2 + $0x4] sm:$0xf]  ;;  %vm214_vm2 = vcmask 1042434  }
   0xa   :  { %v56_v12 = vrot.slane %v55_v10, 4  ;;  %v41_v13 = vsel %vm33_vm0, %v26_v11, 0.0  ;;  %v30_v14 = vld [vmem:[#allocation2 + $0x14] sm:$0xf]  ;;  %v50_v15 = vadd.f32 %v49_v7, %v48_v3  ;;  %v31_v33 = vld [vmem:[#allocation2 + $0x18] sm:$0xf] }
   0xb   :  { %v36_v16 = vadd.f32 %v35_v8, %v34_v4  ;;  %v64_v17 = vadd.f32 %v63_v9, %v62_v5  ;;  %v42_v18 = vrot.slane %v41_v13, 4  ;;  %v69_v20 = vsel %vm33_vm0, %v30_v14, 0.0  ;;  %v32_v48 = vld [vmem:[#allocation2 + $0x1c] sm:$0xf]  ;;  %s314_s14 = smov [#allocation5]   ;;  %s241_s18 = sshll.u32 %s388_s1, 4  ;;  %s242_s18 = int_to_ptr.hbm [resolvable:$true] %s241_s18 }
   0xc   :  { %v57_v19 = vadd.f32 %v56_v12, %v55_v10  ;;  %v51_v21 = vrot.slane %v50_v15, 2  ;;  %v70_v26 = vrot.slane %v69_v20, 4  ;;  %v76_v42 = vsel %vm33_vm0, %v31_v33, 0.0  ;;  %s239_s15 = sshll.u32 %s314_s14, 4  ;;  %s240_s15 = int_to_ptr.vmem [resolvable:$true] %s239_s15 }
   0xd   :  { %v37_v22 = vrot.slane %v36_v16, 2  ;;  %v65_v23 = vrot.slane %v64_v17, 2  ;;  %v43_v24 = vadd.f32 %v42_v18, %v41_v13  ;;  %v77_v47 = vrot.slane %v76_v42, 4 }
   0xe   :  { %v58_v25 = vrot.slane %v57_v19, 2  ;;  %v52_v27 = vadd.f32 %v51_v21, %v50_v15  ;;  %v71_v32 = vadd.f32 %v70_v26, %v69_v20  ;;  %v83_v53 = vsel %vm33_vm0, %v32_v48, 0.0 }
   0xf   :  { %v38_v28 = vadd.f32 %v37_v22, %v36_v16  ;;  %v66_v29 = vadd.f32 %v65_v23, %v64_v17  ;;  %v44_v30 = vrot.slane %v43_v24, 2  ;;  %v78_v52 = vadd.f32 %v77_v47, %v76_v42 }
  0x10   :  { %v59_v31 = vadd.f32 %v58_v25, %v57_v19  ;;  %v53_v34 = vrot.slane %v52_v27, 1  ;;  %v72_v38 = vrot.slane %v71_v32, 2  ;;  %v84_v55 = vrot.slane %v83_v53, 4 }
  0x11   :  { %v39_v35 = vrot.slane %v38_v28, 1  ;;  %v67_v36 = vrot.slane %v66_v29, 1  ;;  %v45_v37 = vadd.f32 %v44_v30, %v43_v24  ;;  %v79_v54 = vrot.slane %v78_v52, 2 }
  0x12   :  { %v336_v39 = vadd.f32 %v53_v34, %v52_v27  ;;  %v73_v43 = vadd.f32 %v72_v38, %v71_v32  ;;  %v60_v44 = vrot.slane %v59_v31, 1  ;;  %v85_v57 = vadd.f32 %v84_v55, %v83_v53 }
  0x13   :  { %v338_v40 = vadd.f32 %v39_v35, %v38_v28  ;;  %v340_v41 = vadd.f32 %v67_v36, %v66_v29  ;;  %v46_v45 = vrot.slane %v45_v37, 1  ;;  %v80_v56 = vadd.f32 %v79_v54, %v78_v52 }
  0x14   :  { %102 = vrot.lane.b32.xlu1 %v336_v39, %s312_s0  ;;  %v74_v46 = vrot.slane %v73_v43, 1  ;;  %v61_v49 = vadd.f32 %v60_v44, %v59_v31  ;;  %v86_v59 = vrot.slane %v85_v57, 2  ;;  %vm217_vm3 = vcmask 1043459  }
  0x15   :  { %98 = vrot.lane.b32.xlu0 %v338_v40, %s312_s0  ;;  %106 = vrot.lane.b32.xlu2 %v340_v41, %s312_s0  ;;  %v47_v50 = vadd.f32 %v46_v45, %v45_v37  ;;  %v81_v58 = vrot.slane %v80_v56, 1  ;;  %vm220_vm4 = vcmask 1044484   ;;  %vm223_vm5 = vcmask 1045509  }
  0x16   :  { %v349_v51 = vadd.f32 %v74_v46, %v73_v43  ;;  %v87_v61 = vadd.f32 %v86_v59, %v85_v57  ;;  %vm226_vm6 = vcmask 1046534   ;;  %vm229_vm7 = vcmask 1047559  }
  0x17   :  { %v361_v60 = vadd.f32 %v81_v58, %v80_v56  ;;  %vm232_vm8 = vcmask 261120  }
  0x18   :  { %v88_v62 = vrot.slane %v87_v61, 1 }
  0x1a   :  { %v89_v63 = vadd.f32 %v88_v62, %v87_v61 }
  0x1c   :  { %104 = vrot.lane.b32.xlu1 %v61_v49, %s312_s0 }
  0x1d   :  { %100 = vrot.lane.b32.xlu0 %v47_v50, %s312_s0  ;;  %108 = vrot.lane.b32.xlu2 %v349_v51, %s312_s0 }
  0x24   :  { %134 = vrot.lane.b32.xlu1 %v336_v39, %s310_s11 }
  0x25   :  { %132 = vrot.lane.b32.xlu0 %v47_v50, %s310_s11  ;;  %130 = vrot.lane.b32.xlu2 %v338_v40, %s310_s11 }
  0x2c   :  { %164 = vrot.lane.b32.xlu1 %v47_v50, %s313_s13 }
  0x2d   :  { %136 = vrot.lane.b32.xlu0 %v61_v49, %s310_s11  ;;  %110 = vrot.lane.b32.xlu2 %v361_v60, %s312_s0 }
  0x34   :  { %166 = vrot.lane.b32.xlu1 %v336_v39, %s313_s13 }
  0x35   :  { %138 = vrot.lane.b32.xlu0 %v340_v41, %s310_s11  ;;  %112 = vrot.lane.b32.xlu2 %v89_v63, %s312_s0 }
  0x3c   :  { %162 = vrot.lane.b32.xlu1 %v338_v40, %s313_s13 }
  0x3d   :  { %140 = vrot.lane.b32.xlu0 %v349_v51, %s310_s11  ;;  %168 = vrot.lane.b32.xlu2 %v61_v49, %s313_s13 }
  0x44   :  { %170 = vrot.lane.b32.xlu1 %v340_v41, %s313_s13 }
  0x45   :  { %142 = vrot.lane.b32.xlu0 %v361_v60, %s310_s11  ;;  %144 = vrot.lane.b32.xlu2 %v89_v63, %s310_s11 }
  0x4c   :  { %174 = vrot.lane.b32.xlu1 %v361_v60, %s313_s13 }
  0x4d   :  { %172 = vrot.lane.b32.xlu0 %v349_v51, %s313_s13  ;;  %176 = vrot.lane.b32.xlu2 %v89_v63, %s313_s13 }
  0x6f   :  { %v107_v0 = vpop.permute.xlu2 %106 }
  0x70   :  { %v126_v26 = vadd.f32 %v107_v0, %v340_v41 }
  0x77   :  { %v109_v1 = vpop.permute.xlu2 %108 }
  0x78   :  { %v127_v43 = vadd.f32 %v109_v1, %v349_v51 }
  0x7f   :  { %v131_v4 = vpop.permute.xlu2 %130 }
  0x86   :  { %v103_v2 = vpop.permute.xlu1 %102 }
  0x87   :  { %v99_v3 = vpop.permute.xlu0 %98  ;;  %v111_v7 = vpop.permute.xlu2 %110  ;;  %v124_v22 = vadd.f32 %v103_v2, %v336_v39 }
  0x88   :  { %v122_v18 = vadd.f32 %v99_v3, %v338_v40  ;;  %v128_v41 = vadd.f32 %v111_v7, %v361_v60 }
  0x8a   :  { %v154_v25 = vadd.f32 %v131_v4, %v122_v18 }
  0x8e   :  { %v105_v5 = vpop.permute.xlu1 %104 }
  0x8f   :  { %v101_v6 = vpop.permute.xlu0 %100  ;;  %v113_v10 = vpop.permute.xlu2 %112  ;;  %v125_v23 = vadd.f32 %v105_v5, %v61_v49 }
  0x90   :  { %v123_v19 = vadd.f32 %v101_v6, %v47_v50  ;;  %v129_v29 = vadd.f32 %v113_v10, %v89_v63 }
  0x96   :  { %v135_v8 = vpop.permute.xlu1 %134 }
  0x97   :  { %v133_v9 = vpop.permute.xlu0 %132  ;;  %v169_v13 = vpop.permute.xlu2 %168  ;;  %v156_v27 = vadd.f32 %v135_v8, %v124_v22 }
  0x98   :  { %v155_v21 = vadd.f32 %v133_v9, %v123_v19 }
  0x9e   :  { %v165_v11 = vpop.permute.xlu1 %164 }
  0x9f   :  { %v137_v12 = vpop.permute.xlu0 %136  ;;  %v145_v20 = vpop.permute.xlu2 %144  ;;  %v187_v24 = vadd.f32 %v165_v11, %v155_v21 }
  0xa0   :  { %v157_v28 = vadd.f32 %v137_v12, %v125_v23  ;;  %v161_v38 = vadd.f32 %v145_v20, %v129_v29 }
  0xa1   :  { %v195_v35 = vmul.f32 0.0625, %v187_v24 }
  0xa2   :  { %v189_v36 = vadd.f32 %v169_v13, %v157_v28 }
  0xa3   :  { %v210_v44 = vrot.slane %v195_v35, 7 }
  0xa4   :  { %v197_v45 = vmul.f32 0.0625, %v189_v36 }
  0xa6   :  { %v167_v14 = vpop.permute.xlu1 %166  ;;  %v216_v51 = vrot.slane %v197_v45, 5 }
  0xa7   :  { %v139_v15 = vpop.permute.xlu0 %138  ;;  %v188_v31 = vadd.f32 %v167_v14, %v156_v27  ;;  %v177_v39 = vpop.permute.xlu2 %176 }
  0xa8   :  { %v158_v32 = vadd.f32 %v139_v15, %v126_v26  ;;  %v193_v47 = vadd.f32 %v177_v39, %v161_v38 }
  0xa9   :  { %v196_v42 = vmul.f32 0.0625, %v188_v31 }
  0xaa   :  { %v201_v59 = vmul.f32 0.0625, %v193_v47 }
  0xab   :  { %v213_v52 = vrot.slane %v196_v42, 6 }
  0xac   :  { %v228_v2 = vrot.slane %v201_v59, 1 }
  0xae   :  { %v163_v16 = vpop.permute.xlu1 %162 }
  0xaf   :  { %v141_v17 = vpop.permute.xlu0 %140  ;;  %v186_v30 = vadd.f32 %v163_v16, %v154_v25 }
  0xb0   :  { %v159_v49 = vadd.f32 %v141_v17, %v127_v43 }
  0xb1   :  { %v194_v40 = vmul.f32 0.0625, %v186_v30 }
  0xb3   :  { %v212_v48 = vsel %vm211_vm1, %v210_v44, %v194_v40 }
  0xb4   :  { %v215_v57 = vsel %vm214_vm2, %v213_v52, %v212_v48 }
  0xb5   :  { %v218_v62 = vsel %vm217_vm3, %v216_v51, %v215_v57 }
  0xb6   :  { %v171_v33 = vpop.permute.xlu1 %170 }
  0xb7   :  { %v143_v34 = vpop.permute.xlu0 %142  ;;  %v190_v37 = vadd.f32 %v171_v33, %v158_v32 }
  0xb8   :  { %v160_v50 = vadd.f32 %v143_v34, %v128_v41 }
  0xb9   :  { %v198_v46 = vmul.f32 0.0625, %v190_v37 }
  0xbb   :  { %v219_v58 = vrot.slane %v198_v46, 4 }
  0xbd   :  { %v221_v1 = vsel %vm220_vm4, %v219_v58, %v218_v62 }
  0xbe   :  { %v175_v53 = vpop.permute.xlu1 %174 }
  0xbf   :  { %v173_v54 = vpop.permute.xlu0 %172  ;;  %v192_v55 = vadd.f32 %v175_v53, %v160_v50 }
  0xc0   :  { %v191_v56 = vadd.f32 %v173_v54, %v159_v49 }
  0xc1   :  { %v200_v60 = vmul.f32 0.0625, %v192_v55 }
  0xc2   :  { %v199_v61 = vmul.f32 0.0625, %v191_v56 }
  0xc3   :  { %v225_v63 = vrot.slane %v200_v60, 2 }
  0xc4   :  { %v222_v0 = vrot.slane %v199_v61, 3 }
  0xc6   :  { %v224_v3 = vsel %vm223_vm5, %v222_v0, %v221_v1 }
  0xc7   :  { %v227_v4 = vsel %vm226_vm6, %v225_v63, %v224_v3 }
  0xc8   :  { %v230_v5 = vsel %vm229_vm7, %v228_v2, %v227_v4 }
  0xc9   :  { %233 = vst.msk [vmem:[#allocation5] sm:$0xff] %vm232_vm8, %v230_v5 }
  0xca   :  { %244 = dma.vmem_to_hbm [thread:$0]  %s240_s15, 128, %s242_s18, [#allocation4]  }
  0xcb   :  { %307 = dma.done.wait [#allocation4], 128  }
  0xcc   :  { %308 = vsyncadd [#allocation4], 4294967168 }
  0xcd   :  { %249 = vsyncpa [#allocation3], 1 }
  0xce   :  { %250 = vsyncpa [#allocation4], 1 }

</bundles_post_ra>
